<compile_context>
chip_gen: v7x
topology: tpu7x:2x2x1
jax: 0.10.0
libtpu: 0.0.40
codegen_flags: <defaults>
</compile_context>

<pallas_src>
import functools

import numpy as np
import jax
import jax.numpy as jnp
from jax import lax
from jax.experimental import pallas as pl
from jax.experimental.pallas import tpu as pltpu


def _fourier_loss_kernel(x_ref, t_ref, f_ref, o_ref, *, use_l1_loss: bool, precision):
    """One grid step: tb input rows and tb target rows, each a flattened H*W image."""
    f = f_ref[...]                       # (HW, 2*HWp): fused [Re | Im] 2-D DFT matrix
    hwp = f.shape[1] // 2
    cd = f.dtype                         # compute dtype (bf16 default, f32 if HIGHEST)
    x = x_ref[...].astype(cd)            # no-op cast when dtypes already match
    t = t_ref[...].astype(cd)
    yx = jnp.dot(x, f, preferred_element_type=jnp.float32, precision=precision)
    yt = jnp.dot(t, f, preferred_element_type=jnp.float32, precision=precision)
    mag_x = jnp.sqrt(yx[:, :hwp] * yx[:, :hwp] + yx[:, hwp:] * yx[:, hwp:])
    mag_t = jnp.sqrt(yt[:, :hwp] * yt[:, :hwp] + yt[:, hwp:] * yt[:, hwp:])
    d = mag_x - mag_t
    loss = jnp.abs(d) if use_l1_loss else d * d
    o_ref[...] = loss.astype(o_ref.dtype)


@functools.lru_cache(maxsize=8)
def _fused_dft2_matrix(h: int, w: int, hwp: int, dtype_name: str):
    """Fused (H*W, 2*HWp) matrix [Re(F2) | Im(F2)], F2[(y*W+x),(j*W+k)] =
    exp(-2*pi*i*(y*j/H + x*k/W)), cached on device per (H, W, pad, dtype)."""
    hw = h * w
    yj = (np.arange(h)[:, None] * np.arange(h)[None, :]) % h        # (H, H)
    xk = (np.arange(w)[:, None] * np.arange(w)[None, :]) % w        # (W, W)
    phase = (yj.astype(np.float64) / h)[:, None, :, None] + \
            (xk.astype(np.float64) / w)[None, :, None, :]           # (H, W, H, W)
    ang = (2.0 * np.pi) * phase.reshape(hw, hw)
    fr = np.cos(ang)
    fi = -np.sin(ang)
    if hwp > hw:                                                    # lane-dense pad
        pad = ((0, 0), (0, hwp - hw))
        fr = np.pad(fr, pad)
        fi = np.pad(fi, pad)
    fused = np.concatenate([fr, fi], axis=1)                        # (HW, 2*HWp)
    return jnp.asarray(fused, dtype=jnp.dtype(dtype_name))


def _vmem_limit_bytes() -> int:
    """Generation-aware VMEM limit: 100 MiB on 128 MiB parts (v5e/v6e), ~46 MiB on
    64 MiB/TC parts (v7x) so scratch / semaphores / pipeline buffers keep headroom."""
    try:
        cap = int(pltpu.get_tpu_info().vmem_capacity_bytes)
    except Exception:
        cap = 64 << 20
    if cap >= (128 << 20):
        return 100 << 20
    return max(32 << 20, min(int(0.72 * cap), cap - (16 << 20)))


def _pick_block_rows(n, hw, hwp, in_bytes, out_bytes, const_bytes, vmem_limit) -> int:
    """Rows (images) per grid step, sized from actual buffer bytes."""
    # x + t double-buffered, output double-buffered, ~12 HWp-wide f32 intermediates
    # (two (., 2*HWp) matmul results, magnitudes, diff/loss, LHS casts, slack).
    per_row = hw * (2 * in_bytes * 2) + hwp * (out_bytes * 2 + 4 * 12)
    avail = int(0.85 * vmem_limit) - const_bytes
    if avail < 8 * per_row:
        # TODO(synk): separable (row-DFT, transpose, col-DFT) kernel for large images.
        raise NotImplementedError(
            f"FourierLoss Pallas kernel: dense DFT matrix for H*W={hw} does not fit "
            f"the {vmem_limit}-byte VMEM budget; a separable kernel is required.")
    tb = avail // per_row
    # Keep the grid >= 2 (ideally 4) steps so v7x's two TensorCores both get work and
    # DMA/compute pipelining is active; below 16 rows a single step is unavoidable.
    if n >= 64:
        tb = min(tb, -(-n // 4))
    elif n >= 16:
        tb = min(tb, -(-n // 2))
    tb = min(tb, 1024, n)
    if n >= 8:
        tb = max(8, (tb // 8) * 8)        # sublane (8) alignment
    return max(1, int(tb))


def fourier_loss(inp, tgt, *, use_l1_loss: bool = True, num_modalities: int = 1,
                 precision=None, out_dtype=jnp.float32):
    """Pallas equivalent of FourierLoss.forward (reduction='none').

    out_dtype defaults to float32 (matches torch); pass jnp.bfloat16 if the consumer
    tolerates bf16 loss values (halves output HBM writeback)."""
    if inp.shape != tgt.shape:
        raise ValueError(f"Invalid input shape: got {inp.shape} and {tgt.shape}.")
    flattened = inp.ndim == 3 and tgt.ndim == 3
    if flattened:
        B, H_W, C = inp.shape
        hw_img = H_W // num_modalities
        side = int(round(hw_img ** 0.5))
        if side * side != hw_img:
            raise ValueError(f"Flattened images must be square; got H*W={hw_img}.")
        four_d = (B, C * num_modalities, side, side)
        x4 = inp.reshape(four_d)          # same memory reinterpretation as torch .view
        t4 = tgt.reshape(four_d)
    else:
        if inp.ndim != 4:
            raise ValueError(f"Invalid input shape: got {inp.shape} and {tgt.shape}.")
        x4, t4 = inp, tgt

    Bc, Cc, H, W = x4.shape
    N = Bc * Cc
    HW = H * W
    HWp = ((HW + 127) // 128) * 128       # lane-dense frequency / output axis

    # Keep the original dtype on the HBM side (bf16 inputs DMA half the bytes);
    # the kernel casts the small LHS block to the compute dtype only if needed.
    xf = x4.reshape(N, HW)
    tf = t4.reshape(N, HW)

    # bf16 constant by default: a default single-pass MXU matmul rounds operands to
    # bf16 anyway, so accuracy is unchanged while VMEM/DMA halve.  A non-default
    # precision (e.g. lax.Precision.HIGHEST) requests the f32 matrix.
    mat_dtype = jnp.float32 if precision is not None else jnp.bfloat16
    fmat = _fused_dft2_matrix(H, W, HWp, jnp.dtype(mat_dtype).name)

    vmem_limit = _vmem_limit_bytes()
    const_one_buf = HW * 2 * HWp * fmat.dtype.itemsize
    const_bytes = 2 * const_one_buf       # size tb assuming double-buffered constants
    tb = _pick_block_rows(N, HW, HWp, jnp.dtype(xf.dtype).itemsize,
                          jnp.dtype(out_dtype).itemsize, const_bytes, vmem_limit)
    grid = (pl.cdiv(N, tb),)

    kernel = functools.partial(_fourier_loss_kernel,
                               use_l1_loss=use_l1_loss, precision=precision)

    def call(single_buffer_const: bool):
        if single_buffer_const:
            const_spec = pl.BlockSpec((HW, 2 * HWp), lambda b: (0, 0),
                                      pipeline_mode=pl.Buffered(1))
        else:
            const_spec = pl.BlockSpec((HW, 2 * HWp), lambda b: (0, 0))
        return pl.pallas_call(
            kernel,
            out_shape=jax.ShapeDtypeStruct((N, HWp), out_dtype),
            grid=grid,
            in_specs=[pl.BlockSpec((tb, HW), lambda b: (b, 0)),     # input rows
                      pl.BlockSpec((tb, HW), lambda b: (b, 0)),     # target rows
                      const_spec],                                  # fused DFT matrix
            out_specs=pl.BlockSpec((tb, HWp), lambda b: (b, 0)),
            compiler_params=pltpu.CompilerParams(
                dimension_semantics=("parallel",),
                vmem_limit_bytes=int(vmem_limit)),
        )(xf, tf, fmat)

    # Single-buffer the constant only when it is big enough to matter; tb was sized
    # for two constant buffers, so the plain path is always VMEM-safe and any genuine
    # compile error still surfaces from the fallback call.
    if hasattr(pl, "Buffered") and const_one_buf >= (2 << 20):
        try:
            out = call(True)
        except Exception:                 # pl.Buffered(1) unsupported in this build
            out = call(False)
    else:
        out = call(False)

    if HWp != HW:
        out = out[:, :HW]
    loss = out.reshape(Bc, Cc, H, W)
    if flattened:
        loss = loss.reshape(B, hw_img * num_modalities, C)
    return loss


def _reference(inp, tgt, use_l1_loss=True):
    mag_i = jnp.abs(jnp.fft.fft2(inp))
    mag_t = jnp.abs(jnp.fft.fft2(tgt))
    d = mag_i - mag_t
    return jnp.abs(d) if use_l1_loss else d * d


if __name__ == "__main__":
    key = jax.random.PRNGKey(0)
    k1, k2 = jax.random.split(key)
    B, C, H, W = 2, 4, 16, 16
    x = jax.random.normal(k1, (B, C, H, W), dtype=jnp.float32)
    t = jax.random.normal(k2, (B, C, H, W), dtype=jnp.float32)

    # L1 branch, default (bf16-level) precision: magnitudes are O(10-60), so a few
    # tenths of absolute slack covers single-pass MXU rounding.
    out = jax.block_until_ready(fourier_loss(x, t, use_l1_loss=True))
    ref = _reference(x, t, use_l1_loss=True)
    assert out.shape == (B, C, H, W)
    np.testing.assert_allclose(np.asarray(out), np.asarray(ref), rtol=2e-2, atol=0.75)

    # MSE branch.
    out_mse = jax.block_until_ready(fourier_loss(x, t, use_l1_loss=False))
    ref_mse = _reference(x, t, use_l1_loss=False)
    np.testing.assert_allclose(np.asarray(out_mse), np.asarray(ref_mse),
                               rtol=5e-2, atol=1.5)

    # High-precision path (f32 DFT matrix + multi-pass matmul): much tighter match.
    out_hp = jax.block_until_ready(
        fourier_loss(x, t, use_l1_loss=True, precision=lax.Precision.HIGHEST))
    np.testing.assert_allclose(np.asarray(out_hp), np.asarray(ref), rtol=1e-3, atol=5e-2)

    # Flattened (B, H*W, C) path from the PyTorch forward (torch .view semantics).
    x3 = x.reshape(B, H * W, C)
    t3 = t.reshape(B, H * W, C)
    out3 = jax.block_until_ready(fourier_loss(x3, t3, use_l1_loss=True))
    ref3 = _reference(x3.reshape(B, C, H, W), t3.reshape(B, C, H, W)).reshape(B, H * W, C)
    np.testing.assert_allclose(np.asarray(out3), np.asarray(ref3), rtol=2e-2, atol=0.75)

    print("KERNEL_OK")
</pallas_src>

<mosaic_0001>
module attributes {stable_mosaic.version = 11 : i64} {
  func.func @_fourier_loss_kernel(%arg0: i32, %arg1: memref<8x256xf32, #tpu.memory_space<vmem>>, %arg2: memref<8x256xf32, #tpu.memory_space<vmem>>, %arg3: memref<256x512xbf16, #tpu.memory_space<vmem>>, %arg4: memref<8x256xf32, #tpu.memory_space<vmem>>) attributes {dimension_semantics = [#tpu.dimension_semantics<parallel>], iteration_bounds = array<i64: 1>, scalar_prefetch = 0 : i64, scratch_operands = 0 : i64, tpu.core_type = #tpu.core_type<tc>, window_params = [{transform_indices = @transform_0, window_bounds = array<i64: 8, 256>}, {transform_indices = @transform_1, window_bounds = array<i64: 8, 256>}, {pipeline_mode = #tpu.pipeline_mode<synchronous>, transform_indices = @transform_2, window_bounds = array<i64: 256, 512>}, {transform_indices = @transform_3, window_bounds = array<i64: 8, 256>}]} {
    %c0 = arith.constant 0 : index
    %c0_0 = arith.constant 0 : index
    %0 = vector.load %arg3[%c0, %c0_0] : memref<256x512xbf16, #tpu.memory_space<vmem>>, vector<256x512xbf16>
    %c0_1 = arith.constant 0 : index
    %c0_2 = arith.constant 0 : index
    %1 = vector.load %arg1[%c0_1, %c0_2] : memref<8x256xf32, #tpu.memory_space<vmem>>, vector<8x256xf32>
    %2 = arith.truncf %1 : vector<8x256xf32> to vector<8x256xbf16>
    %c0_3 = arith.constant 0 : index
    %c0_4 = arith.constant 0 : index
    %3 = vector.load %arg2[%c0_3, %c0_4] : memref<8x256xf32, #tpu.memory_space<vmem>>, vector<8x256xf32>
    %4 = arith.truncf %3 : vector<8x256xf32> to vector<8x256xbf16>
    %cst = arith.constant dense<0.000000e+00> : vector<8x512xf32>
    %5 = tpu.matmul %2, %0, %cst {dimension_numbers = #tpu.dot_dimension_numbers<[1], [0], [0], [1], [0, 0, 1, 1], [], []>} : vector<8x256xbf16>, vector<256x512xbf16>, vector<8x512xf32> -> vector<8x512xf32>
    %cst_5 = arith.constant dense<0.000000e+00> : vector<8x512xf32>
    %6 = tpu.matmul %4, %0, %cst_5 {dimension_numbers = #tpu.dot_dimension_numbers<[1], [0], [0], [1], [0, 0, 1, 1], [], []>} : vector<8x256xbf16>, vector<256x512xbf16>, vector<8x512xf32> -> vector<8x512xf32>
    %7 = vector.extract_strided_slice %5 {offsets = [0, 0], sizes = [8, 256], strides = [1, 1]} : vector<8x512xf32> to vector<8x256xf32>
    %8 = vector.extract_strided_slice %5 {offsets = [0, 0], sizes = [8, 256], strides = [1, 1]} : vector<8x512xf32> to vector<8x256xf32>
    %9 = arith.mulf %7, %8 : vector<8x256xf32>
    %10 = vector.extract_strided_slice %5 {offsets = [0, 256], sizes = [8, 256], strides = [1, 1]} : vector<8x512xf32> to vector<8x256xf32>
    %11 = vector.extract_strided_slice %5 {offsets = [0, 256], sizes = [8, 256], strides = [1, 1]} : vector<8x512xf32> to vector<8x256xf32>
    %12 = arith.mulf %10, %11 : vector<8x256xf32>
    %13 = arith.addf %9, %12 : vector<8x256xf32>
    %14 = math.sqrt %13 : vector<8x256xf32>
    %15 = vector.extract_strided_slice %6 {offsets = [0, 0], sizes = [8, 256], strides = [1, 1]} : vector<8x512xf32> to vector<8x256xf32>
    %16 = vector.extract_strided_slice %6 {offsets = [0, 0], sizes = [8, 256], strides = [1, 1]} : vector<8x512xf32> to vector<8x256xf32>
    %17 = arith.mulf %15, %16 : vector<8x256xf32>
    %18 = vector.extract_strided_slice %6 {offsets = [0, 256], sizes = [8, 256], strides = [1, 1]} : vector<8x512xf32> to vector<8x256xf32>
    %19 = vector.extract_strided_slice %6 {offsets = [0, 256], sizes = [8, 256], strides = [1, 1]} : vector<8x512xf32> to vector<8x256xf32>
    %20 = arith.mulf %18, %19 : vector<8x256xf32>
    %21 = arith.addf %17, %20 : vector<8x256xf32>
    %22 = math.sqrt %21 : vector<8x256xf32>
    %23 = arith.subf %14, %22 : vector<8x256xf32>
    %24 = math.absf %23 : vector<8x256xf32>
    %c0_6 = arith.constant 0 : index
    %c0_7 = arith.constant 0 : index
    %25 = vector.load %arg4[%c0_6, %c0_7] : memref<8x256xf32, #tpu.memory_space<vmem>>, vector<8x256xf32>
    tpu.vector_store %arg4[%c0_6, %c0_7], %24 {strides = array<i32>} : memref<8x256xf32, #tpu.memory_space<vmem>>, vector<8x256xf32>,
    return
  }
  func.func @transform_0(%arg0: i32) -> (i32, i32) {
    %c0_i32 = arith.constant 0 : i32
    %c0_i32_0 = arith.constant 0 : i32
    return %arg0, %c0_i32 : i32, i32
  }
  func.func @transform_1(%arg0: i32) -> (i32, i32) {
    %c0_i32 = arith.constant 0 : i32
    %c0_i32_0 = arith.constant 0 : i32
    return %arg0, %c0_i32 : i32, i32
  }
  func.func @transform_2(%arg0: i32) -> (i32, i32) {
    %c0_i32 = arith.constant 0 : i32
    %c0_i32_0 = arith.constant 0 : i32
    %c0_i32_1 = arith.constant 0 : i32
    return %c0_i32, %c0_i32_0 : i32, i32
  }
  func.func @transform_3(%arg0: i32) -> (i32, i32) {
    %c0_i32 = arith.constant 0 : i32
    %c0_i32_0 = arith.constant 0 : i32
    return %arg0, %c0_i32 : i32, i32
  }
}

</mosaic_0001>

<bundles_post_ra>
// kernel: tpu_custom_call.1
= control target key start
LH: loop header
LB: loop body
LE: loop exit
PB: predicated region body
PF: predicated region fallthrough
CT: control target
= control target key end

     0   :  { %8 = vsyncpa [#allocation3], 0  ;;  %s1269_s0 = inlined_call_operand.hbm [shape: f32[8,256], index: 0, kind: input, shape index: {}]   ;;  %s1270_s1 = inlined_call_operand.hbm [shape: f32[8,256], index: 1, kind: input, shape index: {}]   ;;  %s1271_s2 = inlined_call_operand.hbm [shape: bf16[256,512], index: 2, kind: input, shape index: {}]   ;;  %s1272_s3 = inlined_call_operand.hbm [shape: f32[8,256], index: 3, kind: output, shape index: {}]  }
   0x1   :  { %9 = vsyncpa [#allocation6], 0 }
   0x2   :  { %10 = vsyncpa [#allocation4], 0  ;;  %s938_s12 = smov [#allocation5]   ;;  %s939_s14 = smov [#allocation2]  }
   0x3   :  { %s27_s13 = sshll.u32 %s938_s12, 4  ;;  %s17_s15 = sshll.u32 %s939_s14, 4  ;;  %s28_s13 = int_to_ptr.vmem [resolvable:$true] %s27_s13  ;;  %s18_s15 = int_to_ptr.vmem [resolvable:$true] %s17_s15 }
   0x4   :  { %s844_s18 = scalar_lea.hbm %s1270_s1, 256 }
   0x5   :  { %p845_p0 = scmp.ne.s32.totalorder %s1270_s1, %s844_s18  ;;  %p848_p1 = scmp.lt.u32.totalorder %s844_s18, %s1270_s1 }
   0x7   :  { %p850_p2 = pnand %p848_p1, %p845_p0 }
   0x9   :  { %853 = shalt.err (!%p850_p2)
}
   0xa   :  { %s854_s23 = scalar_lea.vmem %s28_s13, 256  ;;  %p859_p4 = scmp.lt.s32.totalorder %s28_s13, %s28_s13 }
   0xb   :  { %p855_p3 = scmp.ne.s32.totalorder %s28_s13, %s854_s23  ;;  %p860_p5 = scmp.lt.s32.totalorder %s854_s23, %s854_s23 }
   0xd   :  { %p861_p6 = por %p860_p5, %p859_p4 }
   0xf   :  { %p862_p7 = pnand %p861_p6, %p855_p3 }
  0x11   :  { %865 = shalt.err (!%p862_p7)
}
  0x12   :  { %30 = dma.hbm_to_vmem [thread:$0]  %s1270_s1, 256, %s28_s13, [#allocation6]  }
  0x13   :  { %s866_s28 = scalar_lea.hbm %s1269_s0, 256 }
  0x14   :  { %p867_p8 = scmp.ne.s32.totalorder %s1269_s0, %s866_s28  ;;  %p870_p9 = scmp.lt.u32.totalorder %s866_s28, %s1269_s0 }
  0x16   :  { %p872_p10 = pnand %p870_p9, %p867_p8 }
  0x18   :  { %875 = shalt.err (!%p872_p10)
}
  0x19   :  { %s876_s6 = scalar_lea.vmem %s18_s15, 256  ;;  %p881_p12 = scmp.lt.s32.totalorder %s18_s15, %s18_s15 }
  0x1a   :  { %p877_p11 = scmp.ne.s32.totalorder %s18_s15, %s876_s6  ;;  %p882_p13 = scmp.lt.s32.totalorder %s876_s6, %s876_s6 }
  0x1c   :  { %p883_p0 = por %p882_p13, %p881_p12 }
  0x1e   :  { %p884_p1 = pnand %p883_p0, %p877_p11 }
  0x20   :  { %887 = shalt.err (!%p884_p1)
}
  0x21   :  { %20 = dma.hbm_to_vmem [thread:$0]  %s1269_s0, 256, %s18_s15, [#allocation3]  }
  0x22   :  { %s940_s8 = smov [#allocation7]   ;;  %s888_s12 = scalar_lea.hbm %s1271_s2, 8192 }
  0x23   :  { %s36_s9 = sshll.u32 %s940_s8, 4  ;;  %p889_p2 = scmp.ne.s32.totalorder %s1271_s2, %s888_s12  ;;  %s37_s9 = int_to_ptr.vmem [resolvable:$true] %s36_s9 }
  0x24   :  { %p892_p3 = scmp.lt.u32.totalorder %s888_s12, %s1271_s2 }
  0x26   :  { %p894_p4 = pnand %p892_p3, %p889_p2 }
  0x28   :  { %897 = shalt.err (!%p894_p4)
}
  0x29   :  { %s898_s18 = scalar_lea.vmem %s37_s9, 8192  ;;  %p903_p6 = scmp.lt.s32.totalorder %s37_s9, %s37_s9 }
  0x2a   :  { %p899_p5 = scmp.ne.s32.totalorder %s37_s9, %s898_s18  ;;  %p904_p7 = scmp.lt.s32.totalorder %s898_s18, %s898_s18 }
  0x2c   :  { %p905_p8 = por %p904_p7, %p903_p6 }
  0x2e   :  { %p906_p9 = pnand %p905_p8, %p899_p5 }
  0x30   :  { %909 = shalt.err (!%p906_p9)
}
  0x31   :  { %s941_s0 = smov 256   ;;  %s942_s15 = smov 16  }
  0x32   :  { %42 = dma.hbm_to_vmem [thread:$0]  %s1271_s2, 8192, %s37_s9, [#allocation6], %s941_s0, %s941_s0, %s942_s15  }
  0x33   :  { %932 = dma.done.wait [#allocation3], 256  }
  0x34   :  { %933 = vsyncadd [#allocation3], 4294967040 }
  0x35   :  { %934 = dma.done.wait [#allocation6], 8448  }
  0x36   :  { %935 = vsyncadd [#allocation6], 4294958848  ;;  %v1000_v0 = vld [vmem:[#allocation7 + $0x4] ss:$16 sps:$4 sm:$0xff]   ;;  %v1002_v1 = vld [vmem:[#allocation7 + $0xc] ss:$16 sps:$4 sm:$0xff]  }
  0x37   :  { %444 = vmatprep.subr.bf16.mxu0 %v1000_v0  ;;  %v1005_v2 = vld [vmem:[#allocation7] ss:$16 sps:$4 sm:$0xff]   ;;  %v1007_v3 = vld [vmem:[#allocation7 + $0x8] ss:$16 sps:$4 sm:$0xff]   ;;  %485 = vmatprep.subr.bf16.mxu1 %v1002_v1  ;;  %v1010_v4 = vld [vmem:[#allocation7 + $0x24] ss:$16 sps:$4 sm:$0xff]  }
  0x38   :  { %445 = vmatpush1.bf16.msra.mxu0 %v1005_v2  ;;  %486 = vmatpush1.bf16.msra.mxu1 %v1007_v3  ;;  %v1014_v5 = vld [vmem:[#allocation7 + $0x2c] ss:$16 sps:$4 sm:$0xff]   ;;  %v1016_v6 = vld [vmem:[#allocation7 + $0x20] ss:$16 sps:$4 sm:$0xff]   ;;  %v1019_v7 = vld [vmem:[#allocation7 + $0x28] ss:$16 sps:$4 sm:$0xff]  }
  0x39   :  { %446 = vmatprep.subr.bf16.mxu0 %v1010_v4  ;;  %487 = vmatprep.subr.bf16.mxu1 %v1014_v5  ;;  %v1022_v8 = vld [vmem:[#allocation7 + $0x44] ss:$16 sps:$4 sm:$0xff]   ;;  %v1024_v9 = vld [vmem:[#allocation7 + $0x4c] ss:$16 sps:$4 sm:$0xff]   ;;  %v1026_v10 = vld [vmem:[#allocation7 + $0x40] ss:$16 sps:$4 sm:$0xff]  }
  0x3a   :  { %v1028_v11 = vld [vmem:[#allocation7 + $0x48] ss:$16 sps:$4 sm:$0xff]   ;;  %v1032_v12 = vld [vmem:[#allocation7 + $0x64] ss:$16 sps:$4 sm:$0xff]   ;;  %v1036_v13 = vld [vmem:[#allocation7 + $0x6c] ss:$16 sps:$4 sm:$0xff]  }
  0x3b   :  { %v1038_v14 = vld [vmem:[#allocation7 + $0x60] ss:$16 sps:$4 sm:$0xff]   ;;  %v1042_v15 = vld [vmem:[#allocation7 + $0x68] ss:$16 sps:$4 sm:$0xff]   ;;  %v1044_v16 = vld [vmem:[#allocation7 + $0x84] ss:$16 sps:$4 sm:$0xff]  }
  0x3c   :  { %447 = vmatpush1.bf16.msra.mxu0 %v1016_v6  ;;  %488 = vmatpush1.bf16.msra.mxu1 %v1019_v7  ;;  %v1048_v17 = vld [vmem:[#allocation7 + $0x8c] ss:$16 sps:$4 sm:$0xff]   ;;  %v1050_v18 = vld [vmem:[#allocation7 + $0x80] ss:$16 sps:$4 sm:$0xff]   ;;  %v1052_v19 = vld [vmem:[#allocation7 + $0x88] ss:$16 sps:$4 sm:$0xff]  }
  0x3d   :  { %448 = vmatprep.subr.bf16.mxu0 %v1022_v8  ;;  %489 = vmatprep.subr.bf16.mxu1 %v1024_v9  ;;  %v1056_v20 = vld [vmem:[#allocation7 + $0xa4] ss:$16 sps:$4 sm:$0xff]   ;;  %v1060_v21 = vld [vmem:[#allocation7 + $0xac] ss:$16 sps:$4 sm:$0xff]   ;;  %v1062_v22 = vld [vmem:[#allocation7 + $0xa0] ss:$16 sps:$4 sm:$0xff]  }
  0x3e   :  { %v1066_v23 = vld [vmem:[#allocation7 + $0xa8] ss:$16 sps:$4 sm:$0xff]   ;;  %v1068_v24 = vld [vmem:[#allocation7 + $0xc4] ss:$16 sps:$4 sm:$0xff]   ;;  %v1072_v25 = vld [vmem:[#allocation7 + $0xcc] ss:$16 sps:$4 sm:$0xff]  }
  0x3f   :  { %v1074_v26 = vld [vmem:[#allocation7 + $0xc0] ss:$16 sps:$4 sm:$0xff]   ;;  %v1076_v27 = vld [vmem:[#allocation7 + $0xc8] ss:$16 sps:$4 sm:$0xff]   ;;  %v1080_v28 = vld [vmem:[#allocation7 + $0xe4] ss:$16 sps:$4 sm:$0xff]  }
  0x40   :  { %449 = vmatpush1.bf16.msra.mxu0 %v1026_v10  ;;  %490 = vmatpush1.bf16.msra.mxu1 %v1028_v11  ;;  %v1084_v29 = vld [vmem:[#allocation7 + $0xec] ss:$16 sps:$4 sm:$0xff]   ;;  %v1086_v30 = vld [vmem:[#allocation7 + $0xe0] ss:$16 sps:$4 sm:$0xff]   ;;  %v1090_v31 = vld [vmem:[#allocation7 + $0xe8] ss:$16 sps:$4 sm:$0xff]  }
  0x41   :  { %450 = vmatprep.subr.bf16.mxu0 %v1032_v12  ;;  %491 = vmatprep.subr.bf16.mxu1 %v1036_v13  ;;  %v1092_v32 = vld [vmem:[#allocation7 + $0x104] ss:$16 sps:$4 sm:$0xff]   ;;  %v1096_v33 = vld [vmem:[#allocation7 + $0x10c] ss:$16 sps:$4 sm:$0xff]   ;;  %v1098_v34 = vld [vmem:[#allocation7 + $0x100] ss:$16 sps:$4 sm:$0xff]  }
  0x42   :  { %v1100_v35 = vld [vmem:[#allocation7 + $0x108] ss:$16 sps:$4 sm:$0xff]   ;;  %v1104_v36 = vld [vmem:[#allocation7 + $0x124] ss:$16 sps:$4 sm:$0xff]   ;;  %v1108_v37 = vld [vmem:[#allocation7 + $0x12c] ss:$16 sps:$4 sm:$0xff]  }
  0x43   :  { %v1110_v38 = vld [vmem:[#allocation7 + $0x120] ss:$16 sps:$4 sm:$0xff]   ;;  %v1114_v39 = vld [vmem:[#allocation7 + $0x128] ss:$16 sps:$4 sm:$0xff]   ;;  %v1116_v40 = vld [vmem:[#allocation7 + $0x144] ss:$16 sps:$4 sm:$0xff]  }
  0x44   :  { %451 = vmatpush1.bf16.msra.mxu0 %v1038_v14  ;;  %492 = vmatpush1.bf16.msra.mxu1 %v1042_v15  ;;  %v1120_v41 = vld [vmem:[#allocation7 + $0x14c] ss:$16 sps:$4 sm:$0xff]   ;;  %v1122_v42 = vld [vmem:[#allocation7 + $0x140] ss:$16 sps:$4 sm:$0xff]   ;;  %v1124_v43 = vld [vmem:[#allocation7 + $0x148] ss:$16 sps:$4 sm:$0xff]  }
  0x45   :  { %452 = vmatprep.subr.bf16.mxu0 %v1044_v16  ;;  %493 = vmatprep.subr.bf16.mxu1 %v1048_v17  ;;  %v1128_v44 = vld [vmem:[#allocation7 + $0x164] ss:$16 sps:$4 sm:$0xff]   ;;  %v1132_v45 = vld [vmem:[#allocation7 + $0x16c] ss:$16 sps:$4 sm:$0xff]   ;;  %v1136_v48 = vld [vmem:[#allocation7 + $0x160] ss:$16 sps:$4 sm:$0xff]  }
  0x46   :  { %v117_v46 = vld [vmem:[#allocation2 + $0x8] sm:$0xff]  ;;  %v1142_v50 = vld [vmem:[#allocation7 + $0x184] ss:$16 sps:$4 sm:$0xff]   ;;  %v1148_v52 = vld [vmem:[#allocation7 + $0x180] ss:$16 sps:$4 sm:$0xff]   ;;  %s943_s2 = smov [#allocation8]  }
  0x47   :  { %v119_v47 = vpack.c.bf16 %v117_v46, %v117_v46  ;;  %v1138_v49 = vld [vmem:[#allocation7 + $0x168] ss:$16 sps:$4 sm:$0xff]   ;;  %v1144_v51 = vld [vmem:[#allocation7 + $0x18c] ss:$16 sps:$4 sm:$0xff]   ;;  %v1154_v54 = vld [vmem:[#allocation7 + $0x1a4] ss:$16 sps:$4 sm:$0xff]  }
  0x48   :  { %453 = vmatpush1.bf16.msra.mxu0 %v1050_v18  ;;  %494 = vmatpush1.bf16.msra.mxu1 %v1052_v19  ;;  %v1150_v53 = vld [vmem:[#allocation7 + $0x188] ss:$16 sps:$4 sm:$0xff]   ;;  %v1156_v55 = vld [vmem:[#allocation7 + $0x1ac] ss:$16 sps:$4 sm:$0xff]   ;;  %v1160_v56 = vld [vmem:[#allocation7 + $0x1a0] ss:$16 sps:$4 sm:$0xff]  }
  0x49   :  { %454 = vmatprep.subr.bf16.mxu0 %v1056_v20  ;;  %495 = vmatprep.subr.bf16.mxu1 %v1060_v21  ;;  %1277 = vst [vmem:[#allocation12_spill] sm:$0xff] %v1160_v56  ;;  %v1162_v57 = vld [vmem:[#allocation7 + $0x1a8] ss:$16 sps:$4 sm:$0xff]   ;;  %v1166_v58 = vld [vmem:[#allocation7 + $0x1c4] ss:$16 sps:$4 sm:$0xff]   ;;  %s660_s21 = sshll.u32 %s943_s2, 4  ;;  %s661_s21 = int_to_ptr.vmem [resolvable:$true] %s660_s21 }
  0x4a   :  { %476 = vmatprep.mubr.bf16.mxu0 %v119_v47  ;;  %517 = vmatprep.mubr.bf16.mxu1 %v119_v47  ;;  %1278 = vst [vmem:[#allocation13_spill] sm:$0xff] %v1162_v57  ;;  %1279 = vst [vmem:[#allocation14_spill] sm:$0xff] %v1166_v58  ;;  %v1168_v59 = vld [vmem:[#allocation7 + $0x1cc] ss:$16 sps:$4 sm:$0xff]   ;;  %v1172_v60 = vld [vmem:[#allocation7 + $0x1c0] ss:$16 sps:$4 sm:$0xff]   ;;  %p915_p11 = scmp.lt.s32.totalorder %s661_s21, %s661_s21 }
  0x4b   :  { %v1174_v61 = vld [vmem:[#allocation7 + $0x1c8] ss:$16 sps:$4 sm:$0xff]   ;;  %v1178_v62 = vld [vmem:[#allocation7 + $0x1e4] ss:$16 sps:$4 sm:$0xff]   ;;  %v1180_v63 = vld [vmem:[#allocation7 + $0x1ec] ss:$16 sps:$4 sm:$0xff]  }
  0x4c   :  { %455 = vmatpush1.bf16.msra.mxu0 %v1062_v22  ;;  %496 = vmatpush1.bf16.msra.mxu1 %v1066_v23  ;;  %1280 = vst [vmem:[#allocation15_spill] sm:$0xff] %v1174_v61  ;;  %v1184_v46 = vld [vmem:[#allocation7 + $0x1e0] ss:$16 sps:$4 sm:$0xff]   ;;  %v1186_v47 = vld [vmem:[#allocation7 + $0x1e8] ss:$16 sps:$4 sm:$0xff]   ;;  %s910_s22 = scalar_lea.vmem %s661_s21, 256 }
  0x4d   :  { %456 = vmatprep.subr.bf16.mxu0 %v1068_v24  ;;  %497 = vmatprep.subr.bf16.mxu1 %v1072_v25  ;;  %p911_p10 = scmp.ne.s32.totalorder %s661_s21, %s910_s22  ;;  %p916_p12 = scmp.lt.s32.totalorder %s910_s22, %s910_s22 }
  0x4f   :  { %p917_p13 = por %p916_p12, %p915_p11 }
  0x50   :  { %457 = vmatpush1.bf16.msra.mxu0 %v1074_v26  ;;  %498 = vmatpush1.bf16.msra.mxu1 %v1076_v27 }
  0x51   :  { %458 = vmatprep.subr.bf16.mxu0 %v1080_v28  ;;  %499 = vmatprep.subr.bf16.mxu1 %v1084_v29  ;;  %p918_p0 = pnand %p917_p13, %p911_p10 }
  0x54   :  { %459 = vmatpush1.bf16.msra.mxu0 %v1086_v30  ;;  %500 = vmatpush1.bf16.msra.mxu1 %v1090_v31 }
  0x55   :  { %460 = vmatprep.subr.bf16.mxu0 %v1092_v32  ;;  %501 = vmatprep.subr.bf16.mxu1 %v1096_v33 }
  0x58   :  { %461 = vmatpush1.bf16.msra.mxu0 %v1098_v34  ;;  %502 = vmatpush1.bf16.msra.mxu1 %v1100_v35 }
  0x59   :  { %462 = vmatprep.subr.bf16.mxu0 %v1104_v36  ;;  %503 = vmatprep.subr.bf16.mxu1 %v1108_v37 }
  0x5c   :  { %463 = vmatpush1.bf16.msra.mxu0 %v1110_v38  ;;  %504 = vmatpush1.bf16.msra.mxu1 %v1114_v39 }
  0x5d   :  { %464 = vmatprep.subr.bf16.mxu0 %v1116_v40  ;;  %505 = vmatprep.subr.bf16.mxu1 %v1120_v41 }
  0x60   :  { %465 = vmatpush1.bf16.msra.mxu0 %v1122_v42  ;;  %506 = vmatpush1.bf16.msra.mxu1 %v1124_v43 }
  0x61   :  { %466 = vmatprep.subr.bf16.mxu0 %v1128_v44  ;;  %507 = vmatprep.subr.bf16.mxu1 %v1132_v45 }
  0x64   :  { %467 = vmatpush1.bf16.msra.mxu0 %v1136_v48  ;;  %508 = vmatpush1.bf16.msra.mxu1 %v1138_v49 }
  0x65   :  { %468 = vmatprep.subr.bf16.mxu0 %v1142_v50  ;;  %509 = vmatprep.subr.bf16.mxu1 %v1144_v51 }
  0x68   :  { %469 = vmatpush1.bf16.msra.mxu0 %v1148_v52  ;;  %510 = vmatpush1.bf16.msra.mxu1 %v1150_v53 }
  0x69   :  { %470 = vmatprep.subr.bf16.mxu0 %v1154_v54  ;;  %511 = vmatprep.subr.bf16.mxu1 %v1156_v55 }
  0x6c   :  { %471 = vmatpush1.bf16.msra.mxu0 %v1160_v56  ;;  %512 = vmatpush1.bf16.msra.mxu1 %v1162_v57  ;;  %v116_v57 = vld [vmem:[#allocation2] sm:$0xff]  ;;  %v121_v56 = vld [vmem:[#allocation5 + $0x8] sm:$0xff] }
  0x6d   :  { %472 = vmatprep.subr.bf16.mxu0 %v1166_v58  ;;  %513 = vmatprep.subr.bf16.mxu1 %v1168_v59  ;;  %v118_v58 = vpack.c.bf16 %v116_v57, %v116_v57 }
  0x70   :  { %473 = vmatpush1.bf16.msra.mxu0 %v1172_v60  ;;  %514 = vmatpush1.bf16.msra.mxu1 %v1174_v61  ;;  %v123_v61 = vpack.c.bf16 %v121_v56, %v121_v56 }
  0x71   :  { %474 = vmatprep.subr.bf16.mxu0 %v1178_v62  ;;  %515 = vmatprep.subr.bf16.mxu1 %v1180_v63 }
  0x74   :  { %475 = vmatpush1.bf16.msra.mxu0 %v1184_v46  ;;  %516 = vmatpush1.bf16.msra.mxu1 %v1186_v47 }
  0x75   :  { %526 = vmatprep.subr.bf16.mxu0 %v1000_v0  ;;  %567 = vmatprep.subr.bf16.mxu1 %v1002_v1  ;;  %v1281_v0 = vld [vmem:[#allocation12_spill] sm:$0xff]  ;;  %v1282_v1 = vld [vmem:[#allocation13_spill] sm:$0xff] }
  0x77   :  { %477 = vmatmul.mubr.bf16.vlgmr.msra.gmra.mrb[0].mxu0 %v118_v58  ;;  %518 = vmatmul.mubr.bf16.vlgmr.msra.gmra.mrb[0].mxu1 %v118_v58 }
  0x78   :  { %527 = vmatpush1.bf16.msra.mxu0 %v1005_v2  ;;  %568 = vmatpush1.bf16.msra.mxu1 %v1007_v3  ;;  %v1283_v2 = vld [vmem:[#allocation14_spill] sm:$0xff]  ;;  %v1284_v3 = vld [vmem:[#allocation15_spill] sm:$0xff] }
  0x79   :  { %528 = vmatprep.subr.bf16.mxu0 %v1010_v4  ;;  %569 = vmatprep.subr.bf16.mxu1 %v1014_v5  ;;  %v120_v4 = vld [vmem:[#allocation5] sm:$0xff] }
  0x7a   :  { %558 = vmatprep.mubr.bf16.mxu0 %v123_v61  ;;  %599 = vmatprep.mubr.bf16.mxu1 %v123_v61  ;;  %v122_v5 = vpack.c.bf16 %v120_v4, %v120_v4 }
  0x7c   :  { %529 = vmatpush1.bf16.msra.mxu0 %v1016_v6  ;;  %570 = vmatpush1.bf16.msra.mxu1 %v1019_v7 }
  0x7d   :  { %530 = vmatprep.subr.bf16.mxu0 %v1022_v8  ;;  %571 = vmatprep.subr.bf16.mxu1 %v1024_v9 }
  0x80   :  { %531 = vmatpush1.bf16.msra.mxu0 %v1026_v10  ;;  %572 = vmatpush1.bf16.msra.mxu1 %v1028_v11 }
  0x81   :  { %532 = vmatprep.subr.bf16.mxu0 %v1032_v12  ;;  %573 = vmatprep.subr.bf16.mxu1 %v1036_v13 }
  0x84   :  { %533 = vmatpush1.bf16.msra.mxu0 %v1038_v14  ;;  %574 = vmatpush1.bf16.msra.mxu1 %v1042_v15 }
  0x85   :  { %534 = vmatprep.subr.bf16.mxu0 %v1044_v16  ;;  %575 = vmatprep.subr.bf16.mxu1 %v1048_v17 }
  0x88   :  { %535 = vmatpush1.bf16.msra.mxu0 %v1050_v18  ;;  %576 = vmatpush1.bf16.msra.mxu1 %v1052_v19 }
  0x89   :  { %536 = vmatprep.subr.bf16.mxu0 %v1056_v20  ;;  %577 = vmatprep.subr.bf16.mxu1 %v1060_v21 }
  0x8c   :  { %537 = vmatpush1.bf16.msra.mxu0 %v1062_v22  ;;  %578 = vmatpush1.bf16.msra.mxu1 %v1066_v23 }
  0x8d   :  { %538 = vmatprep.subr.bf16.mxu0 %v1068_v24  ;;  %579 = vmatprep.subr.bf16.mxu1 %v1072_v25 }
  0x90   :  { %539 = vmatpush1.bf16.msra.mxu0 %v1074_v26  ;;  %580 = vmatpush1.bf16.msra.mxu1 %v1076_v27 }
  0x91   :  { %540 = vmatprep.subr.bf16.mxu0 %v1080_v28  ;;  %581 = vmatprep.subr.bf16.mxu1 %v1084_v29 }
  0x94   :  { %541 = vmatpush1.bf16.msra.mxu0 %v1086_v30  ;;  %582 = vmatpush1.bf16.msra.mxu1 %v1090_v31 }
  0x95   :  { %542 = vmatprep.subr.bf16.mxu0 %v1092_v32  ;;  %583 = vmatprep.subr.bf16.mxu1 %v1096_v33 }
  0x98   :  { %543 = vmatpush1.bf16.msra.mxu0 %v1098_v34  ;;  %584 = vmatpush1.bf16.msra.mxu1 %v1100_v35 }
  0x99   :  { %544 = vmatprep.subr.bf16.mxu0 %v1104_v36  ;;  %585 = vmatprep.subr.bf16.mxu1 %v1108_v37 }
  0x9c   :  { %545 = vmatpush1.bf16.msra.mxu0 %v1110_v38  ;;  %586 = vmatpush1.bf16.msra.mxu1 %v1114_v39 }
  0x9d   :  { %546 = vmatprep.subr.bf16.mxu0 %v1116_v40  ;;  %587 = vmatprep.subr.bf16.mxu1 %v1120_v41 }
  0xa0   :  { %547 = vmatpush1.bf16.msra.mxu0 %v1122_v42  ;;  %588 = vmatpush1.bf16.msra.mxu1 %v1124_v43 }
  0xa1   :  { %548 = vmatprep.subr.bf16.mxu0 %v1128_v44  ;;  %589 = vmatprep.subr.bf16.mxu1 %v1132_v45 }
  0xa4   :  { %549 = vmatpush1.bf16.msra.mxu0 %v1136_v48  ;;  %590 = vmatpush1.bf16.msra.mxu1 %v1138_v49 }
  0xa5   :  { %550 = vmatprep.subr.bf16.mxu0 %v1142_v50  ;;  %591 = vmatprep.subr.bf16.mxu1 %v1144_v51 }
  0xa8   :  { %551 = vmatpush1.bf16.msra.mxu0 %v1148_v52  ;;  %592 = vmatpush1.bf16.msra.mxu1 %v1150_v53 }
  0xa9   :  { %552 = vmatprep.subr.bf16.mxu0 %v1154_v54  ;;  %593 = vmatprep.subr.bf16.mxu1 %v1156_v55 }
  0xac   :  { %553 = vmatpush1.bf16.msra.mxu0 %v1281_v0  ;;  %594 = vmatpush1.bf16.msra.mxu1 %v1282_v1 }
  0xad   :  { %554 = vmatprep.subr.bf16.mxu0 %v1283_v2  ;;  %595 = vmatprep.subr.bf16.mxu1 %v1168_v59 }
  0xb0   :  { %555 = vmatpush1.bf16.msra.mxu0 %v1172_v60  ;;  %596 = vmatpush1.bf16.msra.mxu1 %v1284_v3 }
  0xb1   :  { %556 = vmatprep.subr.bf16.mxu0 %v1178_v62  ;;  %597 = vmatprep.subr.bf16.mxu1 %v1180_v63 }
  0xb4   :  { %557 = vmatpush1.bf16.msra.mxu0 %v1184_v46  ;;  %598 = vmatpush1.bf16.msra.mxu1 %v1186_v47 }
  0xb7   :  { %559 = vmatmul.mubr.bf16.vlgmr.msra.gmra.mrb[4].mxu0 %v122_v5  ;;  %600 = vmatmul.mubr.bf16.vlgmr.msra.gmra.mrb[4].mxu1 %v122_v5 }
 0x14a   :  { %v478_v6 = vpop.f32.mrb[0].mxu0  ;;  %v519_v7 = vpop.f32.mrb[0].mxu1 }
 0x14b   :  { %v608_v8 = vmul.f32 %v478_v6, %v478_v6  ;;  %v610_v9 = vmul.f32 %v519_v7, %v519_v7  ;;  %v480_v10 = vpop.f32.mrb[1].mxu0  ;;  %v521_v11 = vpop.f32.mrb[1].mxu1 }
 0x14c   :  { %v609_v12 = vmul.f32 %v480_v10, %v480_v10  ;;  %v611_v13 = vmul.f32 %v521_v11, %v521_v11  ;;  %v482_v14 = vpop.f32.mrb[2].mxu0  ;;  %v523_v15 = vpop.f32.mrb[2].mxu1 }
 0x14d   :  { %v612_v16 = vadd.f32 %v610_v9, %v608_v8  ;;  %v483_v17 = vpop.f32.mrb[3].mxu0  ;;  %v524_v18 = vpop.f32.mrb[3].mxu1 }
 0x14e   :  { %v613_v19 = vadd.f32 %v611_v13, %v609_v12 }
 0x14f   :  { %836 = vrsqrt.f32 %v612_v16  ;;  %vm616_vm0 = vcmp.eq.f32.partialorder %v612_v16, inf  ;;  %vm618_vm1 = vcmp.eq.f32.partialorder %v612_v16, 0.0  ;;  %v619_v39 = vand.u32 2147483648, %v612_v16 }
 0x150   :  { %838 = vrsqrt.f32 %v613_v19  ;;  %vm623_vm2 = vcmp.eq.f32.partialorder %v613_v19, inf  ;;  %vm625_vm3 = vcmp.eq.f32.partialorder %v613_v19, 0.0  ;;  %v626_v42 = vand.u32 2147483648, %v613_v19 }
 0x159   :  { %v837_v34 = vpop.eup %836 }
 0x15a   :  { %v839_v35 = vpop.eup %838  ;;  %v615_v36 = vmul.f32 %v837_v34, %v612_v16 }
 0x15b   :  { %v622_v37 = vmul.f32 %v839_v35, %v613_v19 }
 0x15c   :  { %v617_v41 = vsel %vm616_vm0, %v612_v16, %v615_v36 }
 0x15d   :  { %v624_v44 = vsel %vm623_vm2, %v613_v19, %v622_v37  ;;  %v620_v51 = vsel %vm618_vm1, %v619_v39, %v617_v41 }
 0x15e   :  { %v627_v54 = vsel %vm625_vm3, %v626_v42, %v624_v44 }
 0x18a   :  { %v560_v20 = vpop.f32.mrb[4].mxu0  ;;  %v601_v21 = vpop.f32.mrb[4].mxu1 }
 0x18b   :  { %v628_v22 = vmul.f32 %v560_v20, %v560_v20  ;;  %v630_v23 = vmul.f32 %v601_v21, %v601_v21  ;;  %v562_v24 = vpop.f32.mrb[5].mxu0  ;;  %v603_v25 = vpop.f32.mrb[5].mxu1 }
 0x18c   :  { %v629_v26 = vmul.f32 %v562_v24, %v562_v24  ;;  %v631_v27 = vmul.f32 %v603_v25, %v603_v25  ;;  %v564_v28 = vpop.f32.mrb[6].mxu0  ;;  %v605_v29 = vpop.f32.mrb[6].mxu1 }
 0x18d   :  { %v632_v30 = vadd.f32 %v630_v23, %v628_v22  ;;  %v565_v31 = vpop.f32.mrb[7].mxu0  ;;  %v606_v32 = vpop.f32.mrb[7].mxu1 }
 0x18e   :  { %v633_v33 = vadd.f32 %v631_v27, %v629_v26 }
 0x18f   :  { %840 = vrsqrt.f32 %v632_v30  ;;  %vm636_vm4 = vcmp.eq.f32.partialorder %v632_v30, inf  ;;  %v639_v45 = vand.u32 2147483648, %v632_v30  ;;  %vm638_vm5 = vcmp.eq.f32.partialorder %v632_v30, 0.0 }
 0x190   :  { %842 = vrsqrt.f32 %v633_v33  ;;  %vm643_vm6 = vcmp.eq.f32.partialorder %v633_v33, inf  ;;  %v646_v50 = vand.u32 2147483648, %v633_v33  ;;  %vm645_vm7 = vcmp.eq.f32.partialorder %v633_v33, 0.0 }
 0x199   :  { %v841_v38 = vpop.eup %840 }
 0x19a   :  { %v843_v40 = vpop.eup %842  ;;  %v635_v43 = vmul.f32 %v841_v38, %v632_v30 }
 0x19b   :  { %v642_v48 = vmul.f32 %v843_v40, %v633_v33 }
 0x19c   :  { %v637_v49 = vsel %vm636_vm4, %v632_v30, %v635_v43 }
 0x19d   :  { %v640_v52 = vsel %vm638_vm5, %v639_v45, %v637_v49  ;;  %v644_v53 = vsel %vm643_vm6, %v633_v33, %v642_v48 }
 0x19e   :  { %v647_v55 = vsel %vm645_vm7, %v646_v50, %v644_v53  ;;  %v648_v56 = vsub.f32 %v620_v51, %v640_v52 }
 0x19f   :  { %v649_v57 = vsub.f32 %v627_v54, %v647_v55 }
 0x1a0   :  { %v650_v58 = vand.u32 2147483647, %v648_v56 }
 0x1a1   :  { %v651_v59 = vand.u32 2147483647, %v649_v57 }
 0x1a2   :  { %652 = vst [vmem:[#allocation8] sm:$0xff] %v650_v58 }
 0x1a3   :  { %653 = vst [vmem:[#allocation8 + $0x8] sm:$0xff] %v651_v59 }
 0x1a4   :  { %921 = shalt.err (!%p918_p0)
}
 0x1a5   :  { %s922_s25 = scalar_lea.hbm %s1272_s3, 256 }
 0x1a6   :  { %p923_p1 = scmp.ne.s32.totalorder %s1272_s3, %s922_s25  ;;  %p926_p2 = scmp.lt.u32.totalorder %s922_s25, %s1272_s3 }
 0x1a8   :  { %p928_p3 = pnand %p926_p2, %p923_p1 }
 0x1aa   :  { %931 = shalt.err (!%p928_p3)
}
 0x1ab   :  { %663 = dma.vmem_to_hbm [thread:$0]  %s661_s21, 256, %s1272_s3, [#allocation4]  }
 0x1ac   :  { %936 = dma.done.wait [#allocation4], 256  }
 0x1ad   :  { %937 = vsyncadd [#allocation4], 4294967040 }
 0x1ae   :  { %667 = vsyncpa [#allocation3], 1 }
 0x1af   :  { %668 = vsyncpa [#allocation6], 1 }
 0x1b0   :  { %669 = vsyncpa [#allocation4], 1 }

</bundles_post_ra>
